<compile_context>
chip_gen: v7x
topology: tpu7x:2x2x1
jax: 0.10.0
libtpu: 0.0.40
codegen_flags: <defaults>
</compile_context>

<pallas_src>
import functools

import jax
import jax.numpy as jnp
from jax.experimental import pallas as pl
from jax.experimental.pallas import tpu as pltpu


def _ar_link_kernel(zi_ref, zj_ref, out_ref, *, attract_dim):
    # (tile_n, C) elementwise product on the VPU, accumulated in f32.
    prod = zi_ref[...].astype(jnp.float32) * zj_ref[...].astype(jnp.float32)
    C = prod.shape[-1]

    # Static +1 / -1 sign row: +1 for attract features, -1 for repel features.
    col = jax.lax.broadcasted_iota(jnp.int32, (1, C), 1)
    sign = jnp.where(col < attract_dim, 1.0, -1.0).astype(jnp.float32)

    # out[0, n] = sum_c sign[0, c] * prod[n, c]   ==   sign @ prod.T
    # Contracting both minor dims (the flash-attention q@k.T pattern) yields
    # the result directly in lane-dense (1, tile_n) form for an unmasked store.
    out_ref[...] = jax.lax.dot_general(
        sign, prod,
        dimension_numbers=(((1,), (1,)), ((), ())),
        preferred_element_type=jnp.float32,
    )


def ar_link_predictor_forward(z_i, z_j, attract_dim=None, *, tile_n=2048):
    """z_i, z_j: (N, C) arrays. Returns (N,) float32 scores."""
    N, C = z_i.shape
    assert z_j.shape == (N, C)
    if attract_dim is None:
        attract_dim = C // 2            # matches the PyTorch module __init__

    # --- tile selection ------------------------------------------------------
    # Big tiles amortize per-grid-step fixed cost; per-tile VMEM is tiny
    # (2 inputs x 2 buffers x tile_n*C*4 bytes), far under every generation's
    # VMEM budget, so no explicit vmem_limit_bytes is needed.
    tile_n = min(tile_n, N)
    while N % tile_n != 0 and tile_n > 128:
        tile_n //= 2
    if N % tile_n != 0:
        tile_n = N                       # fall back to a single full-array tile
    # Prefer >= 2 grid steps so the parallel axis can shard across v7x's 2 TCs.
    if N // tile_n == 1 and N % 2 == 0 and (N // 2) % 128 == 0:
        tile_n = N // 2
    assert N % tile_n == 0
    assert tile_n % 128 == 0 or tile_n == N, "output stores must stay lane-dense"
    assert tile_n % 8 == 0 or tile_n == N

    grid = (N // tile_n,)
    out = pl.pallas_call(
        functools.partial(_ar_link_kernel, attract_dim=attract_dim),
        out_shape=jax.ShapeDtypeStruct((1, N), jnp.float32),
        grid_spec=pltpu.PrefetchScalarGridSpec(
            num_scalar_prefetch=0,
            grid=grid,
            in_specs=[
                pl.BlockSpec((tile_n, C), lambda i: (i, 0)),   # z_i row tile
                pl.BlockSpec((tile_n, C), lambda i: (i, 0)),   # z_j row tile
            ],
            out_specs=pl.BlockSpec((1, tile_n), lambda i: (0, i)),  # lane-dense
        ),
        compiler_params=pltpu.CompilerParams(
            dimension_semantics=("parallel",)),
    )(z_i, z_j)

    return out.reshape(-1)


if __name__ == "__main__":
    # Small deterministic setup consistent with the module:
    #   in_channels = 16, N (number of candidate edge pairs) = 256.
    N, C = 256, 16
    key = jax.random.PRNGKey(0)
    k_zi, k_zj = jax.random.split(key, 2)
    z_i = jax.random.normal(k_zi, (N, C), dtype=jnp.float32)
    z_j = jax.random.normal(k_zj, (N, C), dtype=jnp.float32)

    y = ar_link_predictor_forward(z_i, z_j)
    y = jax.block_until_ready(y)

    # Plain-JAX reference (same math as the PyTorch forward).
    A = C // 2
    ref = ((z_i[:, :A] * z_j[:, :A]).sum(axis=1)
           - (z_i[:, A:] * z_j[:, A:]).sum(axis=1))
    assert y.shape == (N,)
    assert jnp.allclose(y, ref, atol=1e-5, rtol=1e-5)

    print("KERNEL_OK")
</pallas_src>

<mosaic_0001>
module attributes {stable_mosaic.version = 11 : i64} {
  func.func @_ar_link_kernel(%arg0: i32, %arg1: memref<128x16xf32, #tpu.memory_space<vmem>>, %arg2: memref<128x16xf32, #tpu.memory_space<vmem>>, %arg3: memref<1x128xf32, #tpu.memory_space<vmem>>) attributes {dimension_semantics = [#tpu.dimension_semantics<parallel>], iteration_bounds = array<i64: 2>, scalar_prefetch = 0 : i64, scratch_operands = 0 : i64, tpu.core_type = #tpu.core_type<tc>, window_params = [{transform_indices = @transform_0, window_bounds = array<i64: 128, 16>}, {transform_indices = @transform_1, window_bounds = array<i64: 128, 16>}, {transform_indices = @transform_2, window_bounds = array<i64: 1, 128>}]} {
    %c0 = arith.constant 0 : index
    %c0_0 = arith.constant 0 : index
    %0 = vector.load %arg1[%c0, %c0_0] : memref<128x16xf32, #tpu.memory_space<vmem>>, vector<128x16xf32>
    %c0_1 = arith.constant 0 : index
    %c0_2 = arith.constant 0 : index
    %1 = vector.load %arg2[%c0_1, %c0_2] : memref<128x16xf32, #tpu.memory_space<vmem>>, vector<128x16xf32>
    %2 = arith.mulf %0, %1 : vector<128x16xf32>
    %3 = tpu.iota {dimensions = array<i32: 1>} : vector<1x16xi32>
    %c8_i32 = arith.constant 8 : i32
    %4 = vector.broadcast %c8_i32 : i32 to vector<1x16xi32>
    %5 = arith.cmpi slt, %3, %4 : vector<1x16xi32>
    %cst = arith.constant 1.000000e+00 : f32
    %cst_3 = arith.constant -1.000000e+00 : f32
    %6 = vector.broadcast %cst : f32 to vector<1x16xf32>
    %7 = vector.broadcast %cst_3 : f32 to vector<1x16xf32>
    %8 = arith.select %5, %6, %7 : vector<1x16xi1>, vector<1x16xf32>
    %cst_4 = arith.constant dense<0.000000e+00> : vector<1x128xf32>
    %9 = tpu.matmul %8, %2, %cst_4 {dimension_numbers = #tpu.dot_dimension_numbers<[1], [1], [0], [0], [0, 0, 1, 0], [], []>} : vector<1x16xf32>, vector<128x16xf32>, vector<1x128xf32> -> vector<1x128xf32>
    %c0_5 = arith.constant 0 : index
    %c0_6 = arith.constant 0 : index
    %10 = vector.load %arg3[%c0_5, %c0_6] : memref<1x128xf32, #tpu.memory_space<vmem>>, vector<1x128xf32>
    tpu.vector_store %arg3[%c0_5, %c0_6], %9 {strides = array<i32>} : memref<1x128xf32, #tpu.memory_space<vmem>>, vector<1x128xf32>,
    return
  }
  func.func @transform_0(%arg0: i32) -> (i32, i32) {
    %c0_i32 = arith.constant 0 : i32
    %c0_i32_0 = arith.constant 0 : i32
    return %arg0, %c0_i32 : i32, i32
  }
  func.func @transform_1(%arg0: i32) -> (i32, i32) {
    %c0_i32 = arith.constant 0 : i32
    %c0_i32_0 = arith.constant 0 : i32
    return %arg0, %c0_i32 : i32, i32
  }
  func.func @transform_2(%arg0: i32) -> (i32, i32) {
    %c0_i32 = arith.constant 0 : i32
    %c0_i32_0 = arith.constant 0 : i32
    return %c0_i32, %arg0 : i32, i32
  }
}

</mosaic_0001>

<bundles_post_ra>
// kernel: tpu_custom_call.1
= control target key start
LH: loop header
LB: loop body
LE: loop exit
PB: predicated region body
PF: predicated region fallthrough
CT: control target
= control target key end

     0   :  { %7 = vsyncpa [#allocation3], 0  ;;  %s828_s0 = inlined_call_operand.vmem [shape: f32[256,16], index: 0, kind: input, shape index: {}]   ;;  %s829_s1 = inlined_call_operand.vmem [shape: f32[256,16], index: 1, kind: input, shape index: {}]   ;;  %s830_s2 = inlined_call_operand.hbm [shape: f32[1,256], index: 2, kind: output, shape index: {}]  }
   0x1   :  { %9 = vsyncpa [#allocation3 + $0x1], 0  ;;  %s659_s9 = smov 0   ;;  %s661_s10 = smov 0  }
   0x2   :  { %s663_s11 = smov 0   ;;  %s665_s12 = smov 0  }
   0x3 LB: > { %s419_s13 = sadd.s32 4294967295, %s637_s12   ;;  %s420_s14 = sadd.s32 4294967294, %s637_s12   ;;  %s637_s12 = sphi %s665_s12, %s838_s12   ;;  %s633_s11 = sphi %s663_s11, %s837_s11   ;;  %s629_s10 = sphi %s661_s10, %s836_s10   ;;  %s625_s9 = sphi %s659_s9, %s835_s9  }
   0x4   : > { %s682_s15 = sadd.s32 1, %s637_s12   ;;  %s74_s16 = sadd.s32 1, %s633_s11 }
   0x5   : > { %s71_s17 = ssub.s32 %s637_s12, %s682_s15  ;;  %p84_p0 = scmp.ne.s32.totalorder %s633_s11, %s629_s10 }
   0x6   : > { %p72_p1 = scmp.eq.s32.totalorder %s71_s17, 0  ;;  %p85_p2 = scmp.eq.s32.totalorder %s419_s13, 1 }
   0x7   : > { %p90_p3 = scmp.ne.s32.totalorder %s629_s10, %s625_s9  ;;  %p91_p4 = scmp.eq.s32.totalorder %s420_s14, 1 }
   0x8   : > { %s692_s18 = scalar_select %p72_p1, %s633_s11, %s74_s16  }
   0x9   : > { %p694_p5 = por %p85_p2, %p84_p0  ;;  %p698_p6 = por %p91_p4, %p90_p3 }
   0xa   : > { %p423_p7 = scmp.ge.s32.totalorder %s637_s12, 1  ;;  %p127_p8 = scmp.lt.s32.totalorder %s637_s12, 3 }
   0xc   : > { %p128_p9 = pnand %p423_p7, %p127_p8 }
   0xd   : > { %s704_s21 = sshll.u32 (!%p128_p9), %s419_s13, 4  ;;  %v639_v0 = vmov (!%p128_p9), 0.0|0.0   ;;  %vm640_vm0 = vmmov (!%p128_p9), 0   ;;  %v641_v1 = vmov (!%p128_p9), 0.0   ;;  %vm217_vm1 = vcmask (!%p128_p9), 130048   ;;  %s151_s30 = sand.u32 (!%p128_p9), 1, %s629_s10  }
   0xe   : > { %131 = sbr.rel (%p128_p9) target bundleno = 320 (0x140), region = 28  ;;  %500 = vmatprep.subr.bf16.mxu0 (!%p128_p9), %v639_v0  ;;  %p154_p10 = scmp.lt.s32.totalorder (!%p128_p9), %s704_s21, 31  ;;  %497 = vmatprep.mubr.msk.f32.mxu0 (!%p128_p9), %vm640_vm0, %v641_v1  ;;  %vm725_vm2 = vmpackc.low (!%p128_p9), %vm217_vm1, %vm217_vm1  ;;  %v213_v58 = vlaneseq (!%p128_p9)  ;;  %v642_v61 = vmov (!%p128_p9), -1.0  }
   0xf   : > { %s152_s3 = scalar_lea.vmem (!%p128_p9), [#allocation2], %s151_s30  ;;  %s788_s7 = scalar_lea.hbm (!%p128_p9), %s830_s2, %s704_s21 }
  0x10   : > { %v214_v60 = vand.u32 (!%p128_p9), 127, %v213_v58  ;;  %s353_s4 = sshll.u32 (!%p128_p9), %s152_s3, 4  ;;  %s341_s8 = scalar_lea.sflag (!%p128_p9), [#allocation3], %s151_s30  ;;  %s782_s4 = int_to_ptr.vmem [resolvable:$true] %s353_s4 }
  0x11   : > { %s575_s13 = scalar_lea.vmem (!%p128_p9), %s782_s4, 16  ;;  %s643_s14 = smov (!%p128_p9), [#allocation2]  }
  0x12   : > { %vm215_vm3 = vcmp.lt.s32.totalorder (!%p128_p9), %v214_v60, 8  ;;  %p576_p11 = scmp.ne.s32.totalorder (!%p128_p9), %s782_s4, %s575_s13  ;;  %s579_s16 = sshll.u32 (!%p128_p9), %s643_s14, 4  ;;  %s580_s16 = int_to_ptr.vmem [resolvable:$false] %s579_s16 }
  0x13   : > { %v216_v62 = vsel (!%p128_p9), %vm215_vm3, 1.0, %v642_v61  ;;  %s581_s17 = scalar_lea.vmem (!%p128_p9), %s580_s16, 32  ;;  %p582_p0 = scmp.lt.s32.totalorder (!%p128_p9), %s782_s4, %s580_s16 }
  0x14   : > { %p577_p12 = pnand (!%p128_p9), %p576_p11, %p694_p5  ;;  %p583_p1 = scmp.lt.s32.totalorder (!%p128_p9), %s581_s17, %s575_s13 }
  0x15   : > { %s155_s22 = scalar_select %p154_p10, %s704_s21, 31 }
  0x16   : > { %p578_p13 = pneg %p577_p12  ;;  %p584_p2 = por %p583_p1, %p582_p0 }
  0x17   : > { %s425_s23 = sshll.u32 %s155_s22, 3 }
  0x18   : > { %s712_s26 = scalar_lea.vmem %s828_s0, %s425_s23  ;;  %s717_s29 = scalar_lea.vmem %s829_s1, %s425_s23 }
  0x19   : > { %v165_v2 = vld [vmem:[%s712_s26] sm:$0xff]  ;;  %v166_v3 = vld [vmem:[%s712_s26 + $0x8] sm:$0xff]  ;;  %v167_v9 = vld [vmem:[%s712_s26 + $0x10] sm:$0xff]  ;;  %p585_p3 = pnand %p584_p2, %p578_p13 }
  0x1a   : > { %v181_v4 = vld [vmem:[%s717_s29] sm:$0xff]  ;;  %v182_v5 = vld [vmem:[%s717_s29 + $0x8] sm:$0xff]  ;;  %v168_v10 = vld [vmem:[%s712_s26 + $0x18] sm:$0xff] }
  0x1b   : > { %v197_v6 = vmul.f32 %v181_v4, %v165_v2  ;;  %v198_v7 = vmul.f32 %v182_v5, %v166_v3  ;;  %v183_v11 = vld [vmem:[%s717_s29 + $0x10] sm:$0xff]  ;;  %v184_v12 = vld [vmem:[%s717_s29 + $0x18] sm:$0xff]  ;;  %v169_v17 = vld [vmem:[%s712_s26 + $0x20] sm:$0xff] }
  0x1c   : > { %v199_v14 = vmul.f32 %v183_v11, %v167_v9  ;;  %v200_v15 = vmul.f32 %v184_v12, %v168_v10  ;;  %v170_v18 = vld [vmem:[%s712_s26 + $0x28] sm:$0xff]  ;;  %v185_v19 = vld [vmem:[%s717_s29 + $0x20] sm:$0xff]  ;;  %v171_v24 = vld [vmem:[%s712_s26 + $0x30] sm:$0xff] }
  0x1d   : > { %v501_v13 = vpack.c.bf16 %v198_v7, %v197_v6  ;;  %v186_v20 = vld [vmem:[%s717_s29 + $0x28] sm:$0xff]  ;;  %v201_v21 = vmul.f32 %v185_v19, %v169_v17  ;;  %v172_v25 = vld [vmem:[%s712_s26 + $0x38] sm:$0xff]  ;;  %v187_v26 = vld [vmem:[%s717_s29 + $0x30] sm:$0xff] }
  0x1e   : > { %v505_v16 = vpack.c.bf16 %v200_v15, %v199_v14  ;;  %v202_v22 = vmul.f32 %v186_v20, %v170_v18  ;;  %v188_v27 = vld [vmem:[%s717_s29 + $0x38] sm:$0xff]  ;;  %v203_v28 = vmul.f32 %v187_v26, %v171_v24  ;;  %v173_v31 = vld [vmem:[%s712_s26 + $0x40] sm:$0xff]  ;;  %v174_v32 = vld [vmem:[%s712_s26 + $0x48] sm:$0xff] }
  0x1f   : > { %503 = vmatpush3.bf16.xpose.msk.msra.mxu0 %vm725_vm2, %v501_v13  ;;  %v204_v29 = vmul.f32 %v188_v27, %v172_v25  ;;  %v189_v33 = vld [vmem:[%s717_s29 + $0x40] sm:$0xff]  ;;  %v190_v34 = vld [vmem:[%s717_s29 + $0x48] sm:$0xff]  ;;  %v175_v38 = vld [vmem:[%s712_s26 + $0x50] sm:$0xff] }
  0x20   : > { %504 = vmatprep.subr.bf16.mxu0 %v639_v0  ;;  %v509_v23 = vpack.c.bf16 %v202_v22, %v201_v21  ;;  %v205_v35 = vmul.f32 %v189_v33, %v173_v31  ;;  %v206_v36 = vmul.f32 %v190_v34, %v174_v32  ;;  %v176_v39 = vld [vmem:[%s712_s26 + $0x58] sm:$0xff]  ;;  %v191_v40 = vld [vmem:[%s717_s29 + $0x50] sm:$0xff]  ;;  %v177_v45 = vld [vmem:[%s712_s26 + $0x60] sm:$0xff] }
  0x21   : > { %v513_v30 = vpack.c.bf16 %v204_v29, %v203_v28  ;;  %v192_v41 = vld [vmem:[%s717_s29 + $0x58] sm:$0xff]  ;;  %v207_v42 = vmul.f32 %v191_v40, %v175_v38  ;;  %v178_v46 = vld [vmem:[%s712_s26 + $0x68] sm:$0xff]  ;;  %v193_v47 = vld [vmem:[%s717_s29 + $0x60] sm:$0xff] }
  0x22   : > { %v517_v37 = vpack.c.bf16 %v206_v36, %v205_v35  ;;  %v208_v43 = vmul.f32 %v192_v41, %v176_v39  ;;  %v194_v48 = vld [vmem:[%s717_s29 + $0x68] sm:$0xff]  ;;  %v209_v49 = vmul.f32 %v193_v47, %v177_v45  ;;  %v179_v52 = vld [vmem:[%s712_s26 + $0x70] sm:$0xff]  ;;  %v180_v53 = vld [vmem:[%s712_s26 + $0x78] sm:$0xff] }
  0x23   : > { %v210_v50 = vmul.f32 %v194_v48, %v178_v46  ;;  %v195_v54 = vld [vmem:[%s717_s29 + $0x70] sm:$0xff]  ;;  %v196_v55 = vld [vmem:[%s717_s29 + $0x78] sm:$0xff] }
  0x24   : > { %v521_v44 = vpack.c.bf16 %v208_v43, %v207_v42  ;;  %v211_v56 = vmul.f32 %v195_v54, %v179_v52  ;;  %v212_v57 = vmul.f32 %v196_v55, %v180_v53 }
  0x25   : > { %v525_v51 = vpack.c.bf16 %v210_v50, %v209_v49 }
  0x26   : > { %v529_v59 = vpack.c.bf16 %v212_v57, %v211_v56 }
  0x27   : > { %507 = vmatpush3.bf16.xpose.msk.msra.mxu0 %vm725_vm2, %v505_v16 }
  0x28   : > { %508 = vmatprep.subr.bf16.mxu0 %v639_v0 }
  0x2f   : > { %511 = vmatpush3.bf16.xpose.msk.msra.mxu0 %vm725_vm2, %v509_v23 }
  0x30   : > { %512 = vmatprep.subr.bf16.mxu0 %v639_v0 }
  0x37   : > { %515 = vmatpush3.bf16.xpose.msk.msra.mxu0 %vm725_vm2, %v513_v30 }
  0x38   : > { %516 = vmatprep.subr.bf16.mxu0 %v639_v0 }
  0x3f   : > { %519 = vmatpush3.bf16.xpose.msk.msra.mxu0 %vm725_vm2, %v517_v37 }
  0x40   : > { %520 = vmatprep.subr.bf16.mxu0 %v639_v0 }
  0x47   : > { %523 = vmatpush3.bf16.xpose.msk.msra.mxu0 %vm725_vm2, %v521_v44 }
  0x48   : > { %524 = vmatprep.subr.bf16.mxu0 %v639_v0 }
  0x4f   : > { %527 = vmatpush3.bf16.xpose.msk.msra.mxu0 %vm725_vm2, %v525_v51 }
  0x50   : > { %528 = vmatprep.subr.bf16.mxu0 %v639_v0 }
  0x57   : > { %531 = vmatpush3.bf16.xpose.msk.msra.mxu0 %vm725_vm2, %v529_v59 }
  0x5e   : > { %498 = vmatmul.mubr.msk.f32.vlgmr.msra.gmra.mrb[0].mxu0 %vm217_vm1, %v216_v62 }
 0x131   : > { %v335_v63 = vpop.f32.mrb[0].mxu0 }
 0x132   : > { %339 = vst [vmem:[%s152_s3] sm:$0x1] %v335_v63  ;;  %v499_v0 = vpop.f32.mrb[1].mxu0 }
 0x133   : > { %588 = shalt.err (!%p585_p3)
}
 0x134   : > { %s589_s21 = scalar_lea.hbm %s788_s7, 16  ;;  %s593_s24 = scalar_lea.hbm %s830_s2, 32 }
 0x135   : > { %p590_p4 = scmp.ne.s32.totalorder %s788_s7, %s589_s21  ;;  %p594_p9 = scmp.lt.u32.totalorder %s788_s7, %s830_s2 }
 0x136   : > { %p595_p10 = scmp.lt.u32.totalorder %s593_s24, %s589_s21  ;;  %p597_p12 = scmp.lt.u32.totalorder %s589_s21, %s788_s7 }
 0x137   : > { %p591_p7 = pnand %p590_p4, %p694_p5 }
 0x138   : > { %p596_p11 = por %p595_p10, %p594_p9 }
 0x139   : > { %p592_p8 = pneg %p591_p7 }
 0x13a   : > { %p598_p13 = por %p597_p12, %p596_p11 }
 0x13c   : > { %p599_p0 = pnand %p598_p13, %p592_p8 }
 0x13e   : > { %602 = shalt.err (!%p599_p0)
}
 0x13f   : > { %532 = dma.vmem_to_hbm [thread:$0]  (%p694_p5), %s782_s4, 16, %s788_s7, %s341_s8  }
 0x140 PF: > { %p538_p1 = scmp.ge.s32.totalorder %s637_s12, 2  ;;  %s365_s27 = sand.u32 1, %s625_s9  }
 0x141   : > { %s366_s28 = scalar_lea.sflag [#allocation3], %s365_s27 }
 0x142   : > { %p535_p2 = pnand %p538_p1, %p698_p6 }
 0x144   : > { %620 = dma.done.wait (!%p535_p2), %s366_s28, 16  }
 0x145   : > { %622 = vsyncadd (!%p535_p2), %s366_s28, 4294967280  ;;  %p12_p3 = scmp.ge.s32.totalorder %s682_s15, 4   ;;  %s835_s9 = smov %s629_s10 }
 0x146   : > { %s836_s10 = smov %s633_s11  ;;  %s837_s11 = smov %s692_s18 }
 0x147   : > { %s838_s12 = smov %s682_s15  ;;  %14 = sbr.rel (!%p12_p3) target bundleno = 3 (0x3), region = 66 }
 0x14e   :  { %370 = vsyncpa [#allocation3], 1 }
 0x14f   :  { %372 = vsyncpa [#allocation3 + $0x1], 1 }

</bundles_post_ra>
